<compile_context>
chip_gen: v7x
topology: tpu7x:2x2x1
jax: 0.10.0
libtpu: 0.0.40
codegen_flags: <defaults>
</compile_context>

<pallas_src>
import numpy as np
import jax
import jax.numpy as jnp
from jax.experimental import pallas as pl
from jax.experimental.pallas import tpu as pltpu


# ----------------------------------------------------------------------------
# Glue: build the pool unitary E = dag(circuit unitary)  (tiny, done in numpy)
# ----------------------------------------------------------------------------
def _rx(theta):
    c = np.cos(theta / 2.0)
    s = np.sin(theta / 2.0)
    return np.array([[c, -1j * s], [-1j * s, c]], dtype=np.complex128)


_CNOT = np.array(
    [[1, 0, 0, 0],
     [0, 1, 0, 0],
     [0, 0, 0, 1],
     [0, 0, 1, 0]], dtype=np.complex128)


def _embed(gate, n_qubits, first_qubit):
    """Embed a gate acting on consecutive qubits starting at `first_qubit`.
    Qubit 0 is the most significant (left-most kron factor)."""
    k = int(round(np.log2(gate.shape[0])))
    U = np.eye(2 ** first_qubit, dtype=np.complex128)
    U = np.kron(U, gate)
    rest = n_qubits - first_qubit - k
    U = np.kron(U, np.eye(2 ** rest, dtype=np.complex128))
    return U


def build_qpool_unitary(n_qubits, w0, w1):
    """E_qpool = dag(U_circuit) for the DeQuPoolSX circuit."""
    N = 2 ** n_qubits
    U_total = np.eye(N, dtype=np.complex128)
    for q in range(0, n_qubits, 2):
        gates = [
            _embed(_rx(w0), n_qubits, q),          # rx(q, w0)
            _embed(_rx(w1), n_qubits, q + 1),      # rx(q+1, w1)
            _embed(_CNOT, n_qubits, q),            # cnot(q, q+1)
            _embed(_rx(-w1), n_qubits, q + 1),     # rx(q+1, -w1)
        ]
        for g in gates:
            U_total = g @ U_total                  # later gates left-multiply
    E = U_total.conj().T                           # dag(U)
    return E


def build_superoperator_interleaved(E):
    """Real (2N^2, 2N^2) matrix A_int for the *interleaved* (re, im) layout:
         out_int = x_int @ A_int    <=>    out = E @ x @ dag(E)
    where x_int[:, 2k] = Re(vec_row(x))[k], x_int[:, 2k+1] = Im(vec_row(x))[k].
    Every complex entry a of A becomes the 2x2 block [[Re a, Im a], [-Im a, Re a]].
    All kron / dag / interleave work is done here, on the host, once."""
    E = np.asarray(E, dtype=np.complex128)
    NN = E.shape[0] * E.shape[0]
    M = np.kron(E, np.conj(E))            # vec_row(E X E^H) = M @ vec_row(X)
    A = M.T                               # row-vector form: out_flat = x_flat @ A
    blk = np.zeros((NN, 2, NN, 2), dtype=np.float64)
    blk[:, 0, :, 0] = A.real
    blk[:, 0, :, 1] = A.imag
    blk[:, 1, :, 0] = -A.imag
    blk[:, 1, :, 1] = A.real
    return blk.reshape(2 * NN, 2 * NN).astype(np.float32)


# ----------------------------------------------------------------------------
# Pallas kernel: one real MXU matmul per (batch block, column block)
# ----------------------------------------------------------------------------
def _qpool_kernel(x_ref, a_ref, o_ref):
    # x_ref: (bm, 2*N*N)     interleaved (re, im) flattened inputs   (lane-dense)
    # a_ref: (2*N*N, cn)     real superoperator (full or column half), VMEM-resident
    # o_ref: (bm, cn)        interleaved (re, im) flattened outputs, f32
    o_ref[...] = jnp.dot(x_ref[...], a_ref[...],
                         preferred_element_type=jnp.float32)


def dequpool_sx_forward(E, x, *, compute_dtype=jnp.bfloat16, batch_block=512):
    """E: (N, N) complex pool unitary; x: (B, N, N) complex matrices.
    Returns E @ x @ dag(E), shape (B, N, N), complex64.

    compute_dtype: MXU operand dtype. bfloat16 (default) hits the bf16-native MXU
    and halves HBM/VMEM bytes (accumulation stays f32); float32 gives full
    density-matrix precision at ~2-4x lower throughput."""
    B, N, _ = x.shape
    NN = N * N
    two_nn = 2 * NN

    # Host-side constant: interleaved real superoperator (0.5 MiB bf16 at n=4).
    a_blk = jnp.asarray(build_superoperator_interleaved(E), dtype=compute_dtype)

    # Interleaved (re, im) packing: one fused pass over x (real/imag/stack/convert
    # fuse into a single XLA fusion). Last dim 2*N*N = 512 stays lane-dense.
    # TODO(synk): lax.bitcast_convert_type does not support complex64; if it ever
    # does, this pack and the unpack below become zero-copy bitcasts (the
    # interleaved A layout already matches the in-memory complex64 layout).
    x_flat = x.reshape(B, NN)
    x_packed = jnp.stack(
        [jnp.real(x_flat), jnp.imag(x_flat)], axis=-1
    ).reshape(B, two_nn).astype(compute_dtype)                     # (B, 2NN)

    # Batch tiling: one block for small B, 512-row blocks otherwise. No padding:
    # the ragged last block is handled by Pallas' masked partial-block store
    # (rows are independent, so stale rows in a partial block are harmless).
    bm = B if B <= batch_block else batch_block
    nb = pl.cdiv(B, bm)

    # v7x megacore coverage: if the batch grid has a single step, split the output
    # columns into two 256-wide "parallel" steps so both TensorCores get work.
    # x's block index is constant across the split -> x is still fetched once;
    # the two A halves together are one full A fetch, so HBM traffic is unchanged.
    split_cols = (nb == 1) and (two_nn % 256 == 0)
    if split_cols:
        cn = two_nn // 2
        grid = (nb, 2)
        in_specs = [
            pl.BlockSpec((bm, two_nn), lambda i, j: (i, 0)),       # x batch block
            pl.BlockSpec((two_nn, cn), lambda i, j: (0, j)),       # A column half
        ]
        out_spec = pl.BlockSpec((bm, cn), lambda i, j: (i, j))
        dims = ("parallel", "parallel")
    else:
        cn = two_nn
        grid = (nb,)
        in_specs = [
            pl.BlockSpec((bm, two_nn), lambda i: (i, 0)),          # x batch block
            # Constant block index -> Pallas elides the re-copy: A is DMA'd once.
            pl.BlockSpec((two_nn, cn), lambda i: (0, 0)),          # superoperator
        ]
        out_spec = pl.BlockSpec((bm, cn), lambda i: (i, 0))
        dims = ("parallel",)

    in_bytes = np.dtype(compute_dtype).itemsize
    cost = pl.CostEstimate(
        flops=2 * B * two_nn * two_nn,
        transcendentals=0,
        bytes_accessed=B * two_nn * (in_bytes + 4)                 # x in + f32 out
                       + two_nn * two_nn * in_bytes,               # A once
    )

    out_packed = pl.pallas_call(
        _qpool_kernel,
        out_shape=jax.ShapeDtypeStruct((B, two_nn), jnp.float32),
        grid_spec=pltpu.PrefetchScalarGridSpec(
            num_scalar_prefetch=0,
            grid=grid,
            in_specs=in_specs,
            out_specs=out_spec,
        ),
        compiler_params=pltpu.CompilerParams(dimension_semantics=dims),
        cost_estimate=cost,
    )(x_packed, a_blk)

    # Unpack interleaved (re, im) -> complex64: one fused pass over the output.
    out_ri = out_packed.reshape(B, NN, 2)
    out = jax.lax.complex(out_ri[..., 0], out_ri[..., 1]).reshape(B, N, N)
    return out


# ----------------------------------------------------------------------------
# Driver
# ----------------------------------------------------------------------------
if __name__ == "__main__":
    n_qubits = 4
    N = 2 ** n_qubits          # 16
    B = 2

    # Deterministic parameter init (mirrors the PyTorch __init__):
    #   he_std = gain * 5**-0.5 ; use_wscale=True -> init_std=1, w_mul=he_std*lrmul
    gain, lrmul = 2 ** 0.5, 1.0
    he_std = gain * 5 ** (-0.5)
    init_std = 1.0 / lrmul
    w_mul = he_std * lrmul
    key = jax.random.PRNGKey(0)
    k_w, k_xr, k_xi = jax.random.split(key, 3)
    weight = jax.random.uniform(k_w, (2,), minval=0.0, maxval=2 * np.pi) * init_std
    w = np.asarray(weight) * w_mul   # effective angles used by qpool()

    # Pool unitary E_qpool = dag(circuit unitary)
    E = build_qpool_unitary(n_qubits, float(w[0]), float(w[1]))

    # Input: batch of complex matrices (density-matrix shaped)
    xr = jax.random.normal(k_xr, (B, N, N), dtype=jnp.float32)
    xi = jax.random.normal(k_xi, (B, N, N), dtype=jnp.float32)
    x = (xr + 1j * xi).astype(jnp.complex64)

    # Reference in plain JAX (complex64)
    E64 = jnp.asarray(E, dtype=jnp.complex64)
    ref = jax.block_until_ready(jnp.matmul(jnp.matmul(E64, x), E64.conj().T))

    # Fast path (default): bf16 operands on the MXU, f32 accumulation.
    out_fast = jax.block_until_ready(dequpool_sx_forward(E, x))
    assert np.allclose(np.asarray(out_fast), np.asarray(ref), atol=5e-2, rtol=5e-2)

    # Full-precision path: f32 operands.
    out_f32 = jax.block_until_ready(
        dequpool_sx_forward(E, x, compute_dtype=jnp.float32))
    assert np.allclose(np.asarray(out_f32), np.asarray(ref), atol=1e-4, rtol=1e-4)

    print("KERNEL_OK")
</pallas_src>

<mosaic_0001>
module attributes {stable_mosaic.version = 11 : i64} {
  func.func @_qpool_kernel(%arg0: i32, %arg1: i32, %arg2: memref<2x512xbf16, #tpu.memory_space<vmem>>, %arg3: memref<512x256xbf16, #tpu.memory_space<vmem>>, %arg4: memref<2x256xf32, #tpu.memory_space<vmem>>) attributes {dimension_semantics = [#tpu.dimension_semantics<parallel>, #tpu.dimension_semantics<parallel>], iteration_bounds = array<i64: 1, 2>, scalar_prefetch = 0 : i64, scratch_operands = 0 : i64, tpu.core_type = #tpu.core_type<tc>, window_params = [{transform_indices = @transform_0, window_bounds = array<i64: 2, 512>}, {transform_indices = @transform_1, window_bounds = array<i64: 512, 256>}, {transform_indices = @transform_2, window_bounds = array<i64: 2, 256>}]} {
    %c0 = arith.constant 0 : index
    %c0_0 = arith.constant 0 : index
    %0 = vector.load %arg2[%c0, %c0_0] : memref<2x512xbf16, #tpu.memory_space<vmem>>, vector<2x512xbf16>
    %c0_1 = arith.constant 0 : index
    %c0_2 = arith.constant 0 : index
    %1 = vector.load %arg3[%c0_1, %c0_2] : memref<512x256xbf16, #tpu.memory_space<vmem>>, vector<512x256xbf16>
    %cst = arith.constant dense<0.000000e+00> : vector<2x256xf32>
    %2 = tpu.matmul %0, %1, %cst {dimension_numbers = #tpu.dot_dimension_numbers<[1], [0], [0], [1], [0, 0, 1, 1], [], []>} : vector<2x512xbf16>, vector<512x256xbf16>, vector<2x256xf32> -> vector<2x256xf32>
    %c0_3 = arith.constant 0 : index
    %c0_4 = arith.constant 0 : index
    %3 = vector.load %arg4[%c0_3, %c0_4] : memref<2x256xf32, #tpu.memory_space<vmem>>, vector<2x256xf32>
    tpu.vector_store %arg4[%c0_3, %c0_4], %2 {strides = array<i32>} : memref<2x256xf32, #tpu.memory_space<vmem>>, vector<2x256xf32>,
    return
  }
  func.func @transform_0(%arg0: i32, %arg1: i32) -> (i32, i32) {
    %c0_i32 = arith.constant 0 : i32
    %c0_i32_0 = arith.constant 0 : i32
    return %arg0, %c0_i32 : i32, i32
  }
  func.func @transform_1(%arg0: i32, %arg1: i32) -> (i32, i32) {
    %c0_i32 = arith.constant 0 : i32
    %c0_i32_0 = arith.constant 0 : i32
    return %c0_i32, %arg1 : i32, i32
  }
  func.func @transform_2(%arg0: i32, %arg1: i32) -> (i32, i32) {
    %c0_i32 = arith.constant 0 : i32
    return %arg0, %arg1 : i32, i32
  }
}

</mosaic_0001>

<bundles_post_ra>
// kernel: tpu_custom_call.1
= control target key start
LH: loop header
LB: loop body
LE: loop exit
PB: predicated region body
PF: predicated region fallthrough
CT: control target
= control target key end

     0   :  { %7 = vsyncpa [#allocation3], 0  ;;  %s1533_s0 = inlined_call_operand.hbm [shape: bf16[2,512], index: 0, kind: input, shape index: {}]   ;;  %s1534_s1 = inlined_call_operand.hbm [shape: bf16[512,512], index: 1, kind: input, shape index: {}]   ;;  %s1535_s2 = inlined_call_operand.hbm [shape: f32[2,512], index: 2, kind: output, shape index: {}]  }
   0x1   :  { %8 = vsyncpa [#allocation6], 0 }
   0x2   :  { %10 = vsyncpa [#allocation6 + $0x1], 0 }
   0x3   :  { %11 = vsyncpa [#allocation4], 0 }
   0x4   :  { %13 = vsyncpa [#allocation4 + $0x1], 0  ;;  %s1247_s9 = smov 0   ;;  %s1249_s10 = smov 0  }
   0x5   :  { %s1251_s11 = smov 0   ;;  %s1253_s12 = smov 0  }
   0x6   :  { %s1255_s13 = smov 0   ;;  %s1257_s14 = smov 0  }
   0x7 LB: > { %s819_s15 = sadd.s32 4294967295, %s1223_s14   ;;  %s820_s16 = sadd.s32 4294967294, %s1223_s14   ;;  %s1223_s14 = sphi %s1257_s14, %s19_s14   ;;  %s1219_s13 = sphi %s1255_s13, %s1563_s13   ;;  %s1215_s12 = sphi %s1253_s12, %s1562_s12   ;;  %s1211_s11 = sphi %s1251_s11, %s1561_s11   ;;  %s1207_s10 = sphi %s1249_s10, %s1560_s10   ;;  %s1203_s9 = sphi %s1247_s9, %s1559_s9  }
   0x8   : > { %s64_s17 = sadd.s32 1, %s1211_s11  ;;  %p71_p0 = scmp.ne.s32.totalorder %s1211_s11, %s1207_s10 }
   0x9   : > { %p72_p1 = scmp.eq.s32.totalorder %s1223_s14, 0  ;;  %p77_p2 = scmp.ne.s32.totalorder %s1207_s10, %s1203_s9 }
   0xa   : > { %p1285_p3 = scmp.eq.s32.totalorder %s819_s15, 0  ;;  %p103_p4 = scmp.eq.s32.totalorder %s819_s15, 1 }
   0xb   : > { %p1289_p5 = por %p72_p1, %p71_p0  ;;  %p109_p6 = scmp.eq.s32.totalorder %s820_s16, 1 }
   0xc   : > { %s1542_s18 = scalar_select %p1285_p3, 1, 0 }
   0xd   : > { %p1295_p7 = por %p1285_p3, %p77_p2  ;;  %p1299_p8 = por %p103_p4, %p71_p0 }
   0xe   : > { %p1303_p9 = por %p109_p6, %p77_p2  ;;  %p821_p10 = scmp.ge.s32.totalorder %s1223_s14, 1 }
   0xf   : > { %s1544_s20 = scalar_select %p1295_p7, 1, 0 }
  0x10   : > { %s1545_s21 = scalar_select %p1299_p8, 1, 0 }
  0x11   : > { %s1546_s22 = scalar_select %p1303_p9, 1, 0 }
  0x12   : > { %p116_p11 = scmp.lt.s32.totalorder %s1223_s14, 3  ;;  %s1225_s24 = smov [#allocation2]  }
  0x13   : > { %s132_s25 = sshll.u32 %s1225_s24, 4  ;;  %p927_p1 = scmp.lt.s32.totalorder %s1223_s14, 2  ;;  %s133_s25 = int_to_ptr.vmem [resolvable:$true] %s132_s25 }
  0x14   : > { %p1310_p13 = pnand %p821_p10, %p116_p11  ;;  %s28_s28 = sadd.s32 1, %s1219_s13 }
  0x15   : > { %p1319_p4 = pnand %p927_p1, %p1289_p5  ;;  %p1330_p6 = scmp.ge.s32.totalorder %s28_s28, 2 }
  0x16   : > { %s1547_s23 = scalar_select %p1310_p13, 1, 0 }
  0x17   : > { %p914_p0 = pneg %p1310_p13  ;;  %s143_s30 = sand.u32 1, %s1211_s11  }
  0x18   : > { %s1548_s26 = scalar_select %p1319_p4, 1, 0 }
  0x19   : > { %p1325_p2 = pnand %p914_p0, %p1285_p3  ;;  %s1079_s5 = scalar_lea.hbm %s1533_s0, 64 }
  0x1a   : > { %s1550_s29 = scalar_select %p1330_p6, 1, 0 }
  0x1b   : > { %p1080_p5 = scmp.ne.s32.totalorder %s1533_s0, %s1079_s5  ;;  %p1081_p10 = pneg %p1325_p2 }
  0x1c   : > { %p1086_p0 = scmp.lt.u32.totalorder %s1079_s5, %s1533_s0 }
  0x1d   : > { %p1082_p11 = pnand %p1081_p10, %p1080_p5 }
  0x1f   : > { %p1083_p1 = pneg %p1082_p11 }
  0x21   : > { %p1088_p12 = pnand %p1086_p0, %p1083_p1 }
  0x23   : > { %1091 = shalt.err (!%p1088_p12)
}
  0x24   : > { %s1092_s16 = scalar_lea.vmem %s133_s25, 64  ;;  %p1100_p3 = scmp.lt.s32.totalorder %s133_s25, %s133_s25 }
  0x25   : > { %p1093_p9 = scmp.ne.s32.totalorder %s133_s25, %s1092_s16  ;;  %p1101_p13 = scmp.lt.s32.totalorder %s1092_s16, %s1092_s16 }
  0x27   : > { %p1095_p8 = pnand %p1093_p9, %p1081_p10  ;;  %p1102_p4 = por %p1101_p13, %p1100_p3 }
  0x29   : > { %p1096_p7 = pneg %p1095_p8 }
  0x2b   : > { %p1103_p6 = pnand %p1102_p4, %p1096_p7 }
  0x2d   : > { %1106 = shalt.err (!%p1103_p6)
}
  0x2e   : > { %917 = dma.hbm_to_vmem [thread:$0]  (!%p1325_p2), %s1533_s0, 64, %s133_s25, [#allocation3]  }
  0x2f   : > { %p1551_p9 = scmp.ne.s32.totalorder %s1550_s29, 0  ;;  %s824_s3 = sshll.u32 %s143_s30, 9 }
  0x30   : > { %s902_s5 = sshll.u32 %s1219_s13, 7  ;;  %s147_s8 = scalar_lea.vmem [#allocation5], %s824_s3 }
  0x31   : > { %s1565_s28 = smov (%p1551_p9, %s28_s28), 0  ;;  %s1361_s7 = scalar_lea.hbm %s1534_s1, %s902_s5 }
  0x32   : > { %s61_s4 = ssub.s32 %s1219_s13, %s1565_s28  ;;  %s154_s15 = sshll.u32 %s147_s8, 4  ;;  %s1368_s15 = int_to_ptr.vmem [resolvable:$true] %s154_s15 }
  0x33   : > { %p62_p3 = scmp.eq.s32.totalorder %s61_s4, 0  ;;  %s1370_s29 = scalar_lea.sflag [#allocation6], %s143_s30 }
  0x34   : > { %s1107_s16 = scalar_lea.hbm %s1361_s7, 8192  ;;  %p1552_p8 = scmp.ne.s32.totalorder %s1548_s26, 0 }
  0x35   : > { %s1366_s25 = scalar_select %p62_p3, %s1211_s11, %s64_s17  }
  0x36   : > { %p1108_p7 = scmp.ne.s32.totalorder %s1361_s7, %s1107_s16  ;;  %p1109_p12 = pneg %p1552_p8 }
  0x37   : > { %s1112_s3 = scalar_lea.hbm %s1534_s1, 16384  ;;  %p1113_p2 = scmp.lt.u32.totalorder %s1361_s7, %s1534_s1 }
  0x38   : > { %p1110_p13 = pnand %p1109_p12, %p1108_p7  ;;  %p1114_p6 = scmp.lt.u32.totalorder %s1112_s3, %s1107_s16 }
  0x39   : > { %p1116_p10 = scmp.lt.u32.totalorder %s1107_s16, %s1361_s7 }
  0x3a   : > { %p1111_p4 = pneg %p1110_p13  ;;  %p1115_p5 = por %p1114_p6, %p1113_p2 }
  0x3c   : > { %p1117_p11 = por %p1116_p10, %p1115_p5 }
  0x3e   : > { %p1118_p1 = pnand %p1117_p11, %p1111_p4 }
  0x40   : > { %1121 = shalt.err (!%p1118_p1)
}
  0x41   : > { %s1122_s17 = scalar_lea.vmem %s1368_s15, 8192  ;;  %s1226_s30 = smov [#allocation5]  }
  0x42   : > { %p1123_p0 = scmp.ne.s32.totalorder %s1368_s15, %s1122_s17  ;;  %s1127_s27 = sshll.u32 %s1226_s30, 4  ;;  %s1128_s27 = int_to_ptr.vmem [resolvable:$false] %s1127_s27 }
  0x43   : > { %s1129_s6 = scalar_lea.vmem %s1128_s27, 16384  ;;  %p1130_p7 = scmp.lt.s32.totalorder %s1368_s15, %s1128_s27 }
  0x44   : > { %p1125_p9 = pnand %p1123_p0, %p1109_p12  ;;  %p1131_p13 = scmp.lt.s32.totalorder %s1129_s6, %s1122_s17 }
  0x46   : > { %p1126_p3 = pneg %p1125_p9  ;;  %p1132_p2 = por %p1131_p13, %p1130_p7 }
  0x48   : > { %p1133_p6 = pnand %p1132_p2, %p1126_p3 }
  0x4a   : > { %1136 = shalt.err (!%p1133_p6)
}
  0x4b   : > { %s1227_s8 = smov 256   ;;  %s1228_s16 = smov 128  }
  0x4c   : > { %s1229_s19 = smov 8   ;;  %p1553_p12 = scmp.ne.s32.totalorder %s1547_s23, 0 }
  0x4d   : > { %921 = dma.hbm_to_vmem [thread:$0]  (!%p1552_p8), %s1361_s7, 8192, %s1368_s15, %s1370_s29, %s1227_s8, %s1228_s16, %s1229_s19  }
  0x4e   : > { %166 = sbr.rel (%p1553_p12) target bundleno = 387 (0x183), region = 28  ;;  %p1554_p4 = scmp.ne.s32.totalorder (!%p1553_p12), %s1542_s18, 0 }
  0x55   : > { %1190 = dma.done.wait (%p1554_p4), [#allocation3], 64  }
  0x56   : > { %1192 = vsyncadd (%p1554_p4), [#allocation3], 4294967232  ;;  %s1405_s24 = sand.u32 1, %s1207_s10   ;;  %p1555_p8 = scmp.ne.s32.totalorder %s1544_s20, 0 }
  0x57   : > { %s829_s3 = sshll.u32 %s1405_s24, 9  ;;  %s173_s4 = scalar_lea.sflag [#allocation6], %s1405_s24 }
  0x58   : > { %s1409_s5 = scalar_lea.vmem [#allocation5], %s829_s3 }
  0x59   : > { %1194 = dma.done.wait (%p1555_p8), %s173_s4, 8192  }
  0x5a   : > { %1196 = vsyncadd (%p1555_p8), %s173_s4, 4294959104  ;;  %v983_v0 = vld [vmem:[%s1409_s5 + $0x4] ss:$8 sps:$4 sm:$0xff]   ;;  %v987_v2 = vld [vmem:[%s1409_s5] ss:$8 sps:$4 sm:$0xff]   ;;  %v276_v40 = vlaneseq  ;;  %s830_s18 = sshll.u32 %s1405_s24, 2 }
  0x5b   : > { %v985_v1 = vld [vmem:[%s1409_s5 + $0x104] ss:$8 sps:$4 sm:$0xff]   ;;  %613 = vmatprep.subr.bf16.mxu1 %v983_v0  ;;  %v988_v3 = vld [vmem:[%s1409_s5 + $0x100] ss:$8 sps:$4 sm:$0xff]   ;;  %v989_v4 = vld [vmem:[%s1409_s5 + $0x14] ss:$8 sps:$4 sm:$0xff]  }
  0x5c   : > { %654 = vmatprep.subr.bf16.mxu0 %v985_v1  ;;  %614 = vmatpush1.bf16.msra.mxu1 %v987_v2  ;;  %v991_v5 = vld [vmem:[%s1409_s5 + $0x114] ss:$8 sps:$4 sm:$0xff]   ;;  %v993_v6 = vld [vmem:[%s1409_s5 + $0x10] ss:$8 sps:$4 sm:$0xff]   ;;  %v995_v8 = vld [vmem:[%s1409_s5 + $0x24] ss:$8 sps:$4 sm:$0xff]  }
  0x5d   : > { %655 = vmatpush1.bf16.msra.mxu0 %v988_v3  ;;  %615 = vmatprep.subr.bf16.mxu1 %v989_v4  ;;  %v994_v7 = vld [vmem:[%s1409_s5 + $0x110] ss:$8 sps:$4 sm:$0xff]   ;;  %v997_v9 = vld [vmem:[%s1409_s5 + $0x124] ss:$8 sps:$4 sm:$0xff]   ;;  %v999_v10 = vld [vmem:[%s1409_s5 + $0x20] ss:$8 sps:$4 sm:$0xff]  }
  0x5e   : > { %656 = vmatprep.subr.bf16.mxu0 %v991_v5  ;;  %v1000_v11 = vld [vmem:[%s1409_s5 + $0x120] ss:$8 sps:$4 sm:$0xff]   ;;  %v1001_v12 = vld [vmem:[%s1409_s5 + $0x34] ss:$8 sps:$4 sm:$0xff]   ;;  %v1005_v14 = vld [vmem:[%s1409_s5 + $0x30] ss:$8 sps:$4 sm:$0xff]  }
  0x5f   : > { %v1003_v13 = vld [vmem:[%s1409_s5 + $0x134] ss:$8 sps:$4 sm:$0xff]   ;;  %v1006_v15 = vld [vmem:[%s1409_s5 + $0x130] ss:$8 sps:$4 sm:$0xff]   ;;  %v1007_v16 = vld [vmem:[%s1409_s5 + $0x44] ss:$8 sps:$4 sm:$0xff]  }
  0x60   : > { %616 = vmatpush1.bf16.msra.mxu1 %v993_v6  ;;  %v1009_v17 = vld [vmem:[%s1409_s5 + $0x144] ss:$8 sps:$4 sm:$0xff]   ;;  %v1011_v18 = vld [vmem:[%s1409_s5 + $0x40] ss:$8 sps:$4 sm:$0xff]   ;;  %v1013_v20 = vld [vmem:[%s1409_s5 + $0x54] ss:$8 sps:$4 sm:$0xff]  }
  0x61   : > { %657 = vmatpush1.bf16.msra.mxu0 %v994_v7  ;;  %617 = vmatprep.subr.bf16.mxu1 %v995_v8  ;;  %v1012_v19 = vld [vmem:[%s1409_s5 + $0x140] ss:$8 sps:$4 sm:$0xff]   ;;  %v1015_v21 = vld [vmem:[%s1409_s5 + $0x154] ss:$8 sps:$4 sm:$0xff]   ;;  %v1017_v22 = vld [vmem:[%s1409_s5 + $0x50] ss:$8 sps:$4 sm:$0xff]  }
  0x62   : > { %658 = vmatprep.subr.bf16.mxu0 %v997_v9  ;;  %v1018_v23 = vld [vmem:[%s1409_s5 + $0x150] ss:$8 sps:$4 sm:$0xff]   ;;  %v1019_v24 = vld [vmem:[%s1409_s5 + $0x64] ss:$8 sps:$4 sm:$0xff]   ;;  %v1023_v26 = vld [vmem:[%s1409_s5 + $0x60] ss:$8 sps:$4 sm:$0xff]  }
  0x63   : > { %v1021_v25 = vld [vmem:[%s1409_s5 + $0x164] ss:$8 sps:$4 sm:$0xff]   ;;  %v1024_v27 = vld [vmem:[%s1409_s5 + $0x160] ss:$8 sps:$4 sm:$0xff]   ;;  %v1025_v28 = vld [vmem:[%s1409_s5 + $0x74] ss:$8 sps:$4 sm:$0xff]  }
  0x64   : > { %618 = vmatpush1.bf16.msra.mxu1 %v999_v10  ;;  %v1027_v29 = vld [vmem:[%s1409_s5 + $0x174] ss:$8 sps:$4 sm:$0xff]   ;;  %v1029_v30 = vld [vmem:[%s1409_s5 + $0x70] ss:$8 sps:$4 sm:$0xff]   ;;  %v1031_v32 = vld [vmem:[%s1409_s5 + $0x84] ss:$8 sps:$4 sm:$0xff]  }
  0x65   : > { %659 = vmatpush1.bf16.msra.mxu0 %v1000_v11  ;;  %619 = vmatprep.subr.bf16.mxu1 %v1001_v12  ;;  %v1030_v31 = vld [vmem:[%s1409_s5 + $0x170] ss:$8 sps:$4 sm:$0xff]   ;;  %v1033_v33 = vld [vmem:[%s1409_s5 + $0x184] ss:$8 sps:$4 sm:$0xff]   ;;  %v1035_v34 = vld [vmem:[%s1409_s5 + $0x80] ss:$8 sps:$4 sm:$0xff]  }
  0x66   : > { %660 = vmatprep.subr.bf16.mxu0 %v1003_v13  ;;  %v1036_v35 = vld [vmem:[%s1409_s5 + $0x180] ss:$8 sps:$4 sm:$0xff]   ;;  %v1037_v36 = vld [vmem:[%s1409_s5 + $0x94] ss:$8 sps:$4 sm:$0xff]   ;;  %v1230_v38 = vmov 1966171168  }
  0x67   : > { %v1039_v37 = vld [vmem:[%s1409_s5 + $0x194] ss:$8 sps:$4 sm:$0xff]   ;;  %v274_v39 = vunpack.c.l.s4 %v1230_v38  ;;  %v1041_v41 = vld [vmem:[%s1409_s5 + $0x90] ss:$8 sps:$4 sm:$0xff]   ;;  %v1043_v43 = vld [vmem:[%s1409_s5 + $0xa4] ss:$8 sps:$4 sm:$0xff]  }
  0x68   : > { %620 = vmatpush1.bf16.msra.mxu1 %v1005_v14  ;;  %v1042_v42 = vld [vmem:[%s1409_s5 + $0x190] ss:$8 sps:$4 sm:$0xff]   ;;  %v1045_v44 = vld [vmem:[%s1409_s5 + $0x1a4] ss:$8 sps:$4 sm:$0xff]   ;;  %v277_v46 = vshrl.u32 %v276_v40, 7  ;;  %s903_s20 = sshll.u32 %s1215_s12, 6 }
  0x69   : > { %661 = vmatpush1.bf16.msra.mxu0 %v1006_v15  ;;  %621 = vmatprep.subr.bf16.mxu1 %v1007_v16  ;;  %v275_v45 = vunpack.c.0.s8 %v274_v39  ;;  %v1047_v47 = vld [vmem:[%s1409_s5 + $0xa0] ss:$8 sps:$4 sm:$0xff]   ;;  %v1049_v49 = vld [vmem:[%s1409_s5 + $0xb4] ss:$8 sps:$4 sm:$0xff]   ;;  %v1053_v53 = vld [vmem:[%s1409_s5 + $0xb0] ss:$8 sps:$4 sm:$0xff]   ;;  %s1484_s29 = scalar_lea.hbm %s1535_s2, %s903_s20 }
  0x6a   : > { %662 = vmatprep.subr.bf16.mxu0 %v1009_v17  ;;  %v1048_v48 = vld [vmem:[%s1409_s5 + $0x1a0] ss:$8 sps:$4 sm:$0xff]   ;;  %v1051_v50 = vld [vmem:[%s1409_s5 + $0x1b4] ss:$8 sps:$4 sm:$0xff]   ;;  %v1054_v54 = vld [vmem:[%s1409_s5 + $0x1b0] ss:$8 sps:$4 sm:$0xff]  }
  0x6b   : > { %v278_v51 = vsub.s32 %v275_v45, %v277_v46  ;;  %v831_v52 = vld.sshfl [vmem:[#allocation2] sm:$0x33 pattern:$0x75316420]  ;;  %v1055_v56 = vld [vmem:[%s1409_s5 + $0xc4] ss:$8 sps:$4 sm:$0xff]  }
  0x6c   : > { %622 = vmatpush1.bf16.msra.mxu1 %v1011_v18  ;;  %v272_v55 = vcombine.high %v831_v52, %v831_v52  ;;  %v1057_v57 = vld [vmem:[%s1409_s5 + $0x1c4] ss:$8 sps:$4 sm:$0xff]   ;;  %v1059_v59 = vld [vmem:[%s1409_s5 + $0xc0] ss:$8 sps:$4 sm:$0xff]   ;;  %v1061_v62 = vld [vmem:[%s1409_s5 + $0xd4] ss:$8 sps:$4 sm:$0xff]  }
  0x6d   : > { %663 = vmatpush1.bf16.msra.mxu0 %v1012_v19  ;;  %623 = vmatprep.subr.bf16.mxu1 %v1013_v20  ;;  %v1060_v60 = vld [vmem:[%s1409_s5 + $0x1c0] ss:$8 sps:$4 sm:$0xff]   ;;  %v1063_v63 = vld [vmem:[%s1409_s5 + $0x1d4] ss:$8 sps:$4 sm:$0xff]   ;;  %v1065_v0 = vld [vmem:[%s1409_s5 + $0xd0] ss:$8 sps:$4 sm:$0xff]   ;;  %v279_v8 = vrot.slane %v831_v52, %v278_v51 }
  0x6e   : > { %664 = vmatprep.subr.bf16.mxu0 %v1015_v21  ;;  %v286_v58 = vrot.slane %v272_v55, %v278_v51  ;;  %v1066_v1 = vld [vmem:[%s1409_s5 + $0x1d0] ss:$8 sps:$4 sm:$0xff]   ;;  %v1067_v2 = vld [vmem:[%s1409_s5 + $0xe4] ss:$8 sps:$4 sm:$0xff]   ;;  %v1071_v4 = vld [vmem:[%s1409_s5 + $0xe0] ss:$8 sps:$4 sm:$0xff]  }
  0x6f   : > { %v1069_v3 = vld [vmem:[%s1409_s5 + $0x1e4] ss:$8 sps:$4 sm:$0xff]   ;;  %v1072_v5 = vld [vmem:[%s1409_s5 + $0x1e0] ss:$8 sps:$4 sm:$0xff]   ;;  %v1073_v6 = vld [vmem:[%s1409_s5 + $0xf4] ss:$8 sps:$4 sm:$0xff]   ;;  %v287_v11 = vcombine.high %v279_v8, %v279_v8 }
  0x70   : > { %624 = vmatpush1.bf16.msra.mxu1 %v1017_v22  ;;  %v288_v61 = vcombine.high %v286_v58, %v286_v58  ;;  %645 = vmatprep.mubr.bf16.mxu1 %v286_v58  ;;  %v1075_v7 = vld [vmem:[%s1409_s5 + $0x1f4] ss:$8 sps:$4 sm:$0xff]   ;;  %v1077_v9 = vld [vmem:[%s1409_s5 + $0xf0] ss:$8 sps:$4 sm:$0xff]   ;;  %s196_s23 = scalar_lea.vmem [#allocation7], %s830_s18  ;;  %s708_s12 = scalar_lea.sflag [#allocation4], %s1405_s24 }
  0x71   : > { %665 = vmatpush1.bf16.msra.mxu0 %v1018_v23  ;;  %625 = vmatprep.subr.bf16.mxu1 %v1019_v24  ;;  %v1078_v10 = vld [vmem:[%s1409_s5 + $0x1f0] ss:$8 sps:$4 sm:$0xff]   ;;  %s724_s26 = sshll.u32 %s196_s23, 4  ;;  %p1556_p10 = scmp.ne.s32.totalorder %s1545_s21, 0  ;;  %s1486_s26 = int_to_ptr.vmem [resolvable:$true] %s724_s26 }
  0x72   : > { %666 = vmatprep.subr.bf16.mxu0 %v1021_v25  ;;  %686 = vmatprep.mubr.bf16.mxu0 %v288_v61  ;;  %s1137_s17 = scalar_lea.vmem %s1486_s26, 64  ;;  %s1231_s30 = smov [#allocation7]  }
  0x73   : > { %p1138_p5 = scmp.ne.s32.totalorder %s1486_s26, %s1137_s17  ;;  %s1141_s27 = sshll.u32 %s1231_s30, 4  ;;  %s1142_s27 = int_to_ptr.vmem [resolvable:$false] %s1141_s27 }
  0x74   : > { %626 = vmatpush1.bf16.msra.mxu1 %v1023_v26  ;;  %s1143_s6 = scalar_lea.vmem %s1142_s27, 128  ;;  %p1144_p0 = scmp.lt.s32.totalorder %s1486_s26, %s1142_s27 }
  0x75   : > { %667 = vmatpush1.bf16.msra.mxu0 %v1024_v27  ;;  %627 = vmatprep.subr.bf16.mxu1 %v1025_v28  ;;  %p1139_p11 = pnand %p1138_p5, %p1556_p10  ;;  %p1145_p9 = scmp.lt.s32.totalorder %s1143_s6, %s1137_s17 }
  0x76   : > { %668 = vmatprep.subr.bf16.mxu0 %v1027_v29 }
  0x77   : > { %p1140_p1 = pneg %p1139_p11  ;;  %p1146_p3 = por %p1145_p9, %p1144_p0 }
  0x78   : > { %628 = vmatpush1.bf16.msra.mxu1 %v1029_v30 }
  0x79   : > { %669 = vmatpush1.bf16.msra.mxu0 %v1030_v31  ;;  %629 = vmatprep.subr.bf16.mxu1 %v1031_v32  ;;  %p1147_p7 = pnand %p1146_p3, %p1140_p1 }
  0x7a   : > { %670 = vmatprep.subr.bf16.mxu0 %v1033_v33 }
  0x7c   : > { %630 = vmatpush1.bf16.msra.mxu1 %v1035_v34 }
  0x7d   : > { %671 = vmatpush1.bf16.msra.mxu0 %v1036_v35  ;;  %631 = vmatprep.subr.bf16.mxu1 %v1037_v36 }
  0x7e   : > { %672 = vmatprep.subr.bf16.mxu0 %v1039_v37 }
  0x80   : > { %632 = vmatpush1.bf16.msra.mxu1 %v1041_v41 }
  0x81   : > { %673 = vmatpush1.bf16.msra.mxu0 %v1042_v42  ;;  %633 = vmatprep.subr.bf16.mxu1 %v1043_v43 }
  0x82   : > { %674 = vmatprep.subr.bf16.mxu0 %v1045_v44 }
  0x84   : > { %634 = vmatpush1.bf16.msra.mxu1 %v1047_v47 }
  0x85   : > { %675 = vmatpush1.bf16.msra.mxu0 %v1048_v48  ;;  %635 = vmatprep.subr.bf16.mxu1 %v1049_v49 }
  0x86   : > { %676 = vmatprep.subr.bf16.mxu0 %v1051_v50 }
  0x88   : > { %636 = vmatpush1.bf16.msra.mxu1 %v1053_v53 }
  0x89   : > { %677 = vmatpush1.bf16.msra.mxu0 %v1054_v54  ;;  %637 = vmatprep.subr.bf16.mxu1 %v1055_v56 }
  0x8a   : > { %678 = vmatprep.subr.bf16.mxu0 %v1057_v57 }
  0x8c   : > { %638 = vmatpush1.bf16.msra.mxu1 %v1059_v59 }
  0x8d   : > { %679 = vmatpush1.bf16.msra.mxu0 %v1060_v60  ;;  %639 = vmatprep.subr.bf16.mxu1 %v1061_v62 }
  0x8e   : > { %680 = vmatprep.subr.bf16.mxu0 %v1063_v63 }
  0x90   : > { %640 = vmatpush1.bf16.msra.mxu1 %v1065_v0 }
  0x91   : > { %681 = vmatpush1.bf16.msra.mxu0 %v1066_v1  ;;  %641 = vmatprep.subr.bf16.mxu1 %v1067_v2 }
  0x92   : > { %682 = vmatprep.subr.bf16.mxu0 %v1069_v3 }
  0x94   : > { %642 = vmatpush1.bf16.msra.mxu1 %v1071_v4 }
  0x95   : > { %683 = vmatpush1.bf16.msra.mxu0 %v1072_v5  ;;  %643 = vmatprep.subr.bf16.mxu1 %v1073_v6 }
  0x96   : > { %684 = vmatprep.subr.bf16.mxu0 %v1075_v7 }
  0x98   : > { %644 = vmatpush1.bf16.msra.mxu1 %v1077_v9 }
  0x99   : > { %685 = vmatpush1.bf16.msra.mxu0 %v1078_v10 }
  0x9b   : > { %646 = vmatmul.mubr.bf16.vlgmr.msra.gmra.mrb[0].mxu1 %v279_v8 }
  0x9c   : > { %687 = vmatmul.mubr.bf16.vlgmr.msra.gmra.mrb[0].mxu0 %v287_v11 }
 0x16e   : > { %v647_v12 = vpop.f32.mrb[0].mxu1 }
 0x16f   : > { %v688_v13 = vpop.f32.mrb[0].mxu0  ;;  %v649_v15 = vpop.f32.mrb[1].mxu1 }
 0x170   : > { %v689_v14 = vadd.f32 %v688_v13, %v647_v12  ;;  %v690_v16 = vpop.f32.mrb[1].mxu0  ;;  %v651_v18 = vpop.f32.mrb[2].mxu1 }
 0x171   : > { %v691_v17 = vadd.f32 %v690_v16, %v649_v15  ;;  %v692_v19 = vpop.f32.mrb[2].mxu0  ;;  %v652_v20 = vpop.f32.mrb[3].mxu1 }
 0x172   : > { %v693_v21 = vpop.f32.mrb[3].mxu0 }
 0x173   : > { %v697_v22 = vcombine.low %v689_v14, %v691_v17 }
 0x175   : > { %896 = vst.sshfl [vmem:[%s196_s23] sm:$0x33 pattern:$0x76325410] %v697_v22 }
 0x176   : > { %1150 = shalt.err (!%p1147_p7)
}
 0x177   : > { %s1151_s8 = scalar_lea.hbm %s1484_s29, 64  ;;  %s1155_s24 = scalar_lea.hbm %s1535_s2, 128 }
 0x178   : > { %p1152_p13 = scmp.ne.s32.totalorder %s1484_s29, %s1151_s8  ;;  %p1156_p12 = scmp.lt.u32.totalorder %s1484_s29, %s1535_s2 }
 0x179   : > { %p1157_p4 = scmp.lt.u32.totalorder %s1155_s24, %s1151_s8  ;;  %p1159_p5 = scmp.lt.u32.totalorder %s1151_s8, %s1484_s29 }
 0x17a   : > { %p1153_p2 = pnand %p1152_p13, %p1556_p10 }
 0x17b   : > { %p1158_p8 = por %p1157_p4, %p1156_p12 }
 0x17c   : > { %p1154_p6 = pneg %p1153_p2 }
 0x17d   : > { %p1160_p11 = por %p1159_p5, %p1158_p8 }
 0x17f   : > { %p1161_p1 = pnand %p1160_p11, %p1154_p6 }
 0x181   : > { %1164 = shalt.err (!%p1161_p1)
}
 0x182   : > { %912 = dma.vmem_to_hbm [thread:$0]  (%p1556_p10), %s1486_s26, 64, %s1484_s29, %s708_s12  }
 0x183 PF: > { %s736_s5 = sand.u32 1, %s1203_s9   ;;  %p1557_p0 = scmp.ne.s32.totalorder %s1546_s22, 0 }
 0x184   : > { %p1558_p9 = scmp.ge.s32.totalorder %s1223_s14, 2  ;;  %s737_s18 = scalar_lea.sflag [#allocation4], %s736_s5 }
 0x186   : > { %p923_p3 = pnand %p1558_p9, %p1557_p0 }
 0x188   : > { %1198 = dma.done.wait (!%p923_p3), %s737_s18, 64  }
 0x189   : > { %1200 = vsyncadd (!%p923_p3), %s737_s18, 4294967232  ;;  %s19_s14 = sadd.s32 1, %s1223_s14   ;;  %s1559_s9 = smov %s1207_s10 }
 0x18a   : > { %p16_p7 = scmp.ge.s32.totalorder %s19_s14, 4   ;;  %s1560_s10 = smov %s1211_s11 }
 0x18b   : > { %s1561_s11 = smov %s1366_s25  ;;  %s1562_s12 = smov %s1219_s13 }
 0x18c   : > { %s1563_s13 = smov %s1565_s28  ;;  %18 = sbr.rel (!%p16_p7) target bundleno = 7 (0x7), region = 79 }
 0x193   :  { %742 = vsyncpa [#allocation3], 1 }
 0x194   :  { %744 = vsyncpa [#allocation3 + $0x1], 1 }
 0x195   :  { %745 = vsyncpa [#allocation6], 1 }
 0x196   :  { %747 = vsyncpa [#allocation6 + $0x1], 1 }
 0x197   :  { %748 = vsyncpa [#allocation4], 1 }
 0x198   :  { %750 = vsyncpa [#allocation4 + $0x1], 1 }

</bundles_post_ra>
